<compile_context>
chip_gen: v5e
topology: v5e:2x2
jax: 0.10.0
libtpu: 0.0.40
codegen_flags: <defaults>
</compile_context>

<pallas_src>
import functools

import jax
import jax.numpy as jnp
from jax import lax
from jax.experimental import pallas as pl
from jax.experimental.pallas import tpu as pltpu


def _vmem_capacity_bytes() -> int:
    try:
        cap = int(pltpu.get_tpu_info().vmem_capacity_bytes)
        if cap > 0:
            return cap
    except Exception:
        pass
    return 64 * 1024 * 1024  # conservative default == v7x per-TC VMEM


def _divisor_tiles(dim: int):
    """Descending multiples of 128 that divide `dim` (or [dim] for ragged dims)."""
    if dim % 128 == 0:
        return [t for t in range(dim, 0, -128) if dim % t == 0]
    return [dim]


# ---------------------------------------------------------------------------
# Phase 1: normalize (unbiased std), cast to compute dtype, f32 diagonal of c.
# ---------------------------------------------------------------------------
def _norm_kernel(za_ref, zb_ref, za_out_ref, zb_out_ref, diag_ref, *, n: int):
    inv_n = jnp.float32(1.0 / n)
    inv_nm1 = jnp.float32(1.0 / (n - 1))

    def normalize(z_ref):
        z = z_ref[...]                                     # (N, td) f32
        mean = jnp.sum(z, axis=0, keepdims=True) * inv_n   # (1, td)
        cent = z - mean
        var = jnp.sum(cent * cent, axis=0, keepdims=True) * inv_nm1
        # NOTE: zero feature variance -> inf/NaN, matching torch's std division.
        return cent * lax.rsqrt(var)                       # (N, td) f32

    za_n = normalize(za_ref)
    zb_n = normalize(zb_ref)
    za_out_ref[...] = za_n.astype(za_out_ref.dtype)
    zb_out_ref[...] = zb_n.astype(zb_out_ref.dtype)
    # f32 diagonal of c: diag_k = (1/N) * sum_n za_n[n,k] * zb_n[n,k]
    diag_ref[...] = jnp.sum(za_n * zb_n, axis=0, keepdims=True) * inv_n


# ---------------------------------------------------------------------------
# Phase 2: tiled lambda * sum(c^2) — matmul + square + VPU group-reduce only.
# ---------------------------------------------------------------------------
def _corr_kernel(za_ref, zb_ref, out_ref, *, lam_over_n2: float):
    j = pl.program_id(1)

    @pl.when(j == 0)
    def _():
        out_ref[...] = jnp.zeros_like(out_ref)

    # (td_i, td_j) = za_tile.T @ zb_tile : contract batch axis on the MXU.
    c = lax.dot_general(
        za_ref[...], zb_ref[...],
        dimension_numbers=(((0,), (0,)), ((), ())),
        preferred_element_type=jnp.float32,
    )
    sq = c * c
    ti, tj = sq.shape
    # Layout-preserving (ti//8, 8, tj) view; axis-0 sum is pure VPU adds
    # (no cross-lane XLU reduce in the hot loop).
    partial = jnp.sum(sq.reshape(ti // 8, 8, tj), axis=0)        # (8, td_j)
    out_ref[...] += (jnp.float32(lam_over_n2) * partial)[None]   # (1, 8, td_j)


# ---------------------------------------------------------------------------
# Wrapper.
# ---------------------------------------------------------------------------
def barlow_twins_loss(z_a: jax.Array, z_b: jax.Array,
                      lambda_param: float = 0.005, *,
                      use_bf16_mxu: bool = True,
                      tile_i: int | None = None,
                      tile_j: int | None = None) -> jax.Array:
    """Pallas TPU implementation of BarlowTwinsLoss.forward (gather_distributed=False)."""
    assert z_a.shape == z_b.shape and z_a.ndim == 2
    n, d = z_a.shape
    assert n >= 2, "unbiased std (ddof=1) requires batch size >= 2"
    z_a = z_a.astype(jnp.float32)
    z_b = z_b.astype(jnp.float32)

    compute_dtype = jnp.bfloat16 if use_bf16_mxu else jnp.float32
    itemsize = jnp.dtype(compute_dtype).itemsize

    vmem_cap = _vmem_capacity_bytes()
    vmem_budget = int(0.60 * vmem_cap)   # tile-sizing budget (pipeline headroom)
    vmem_limit = int(0.75 * vmem_cap)    # never request full physical VMEM (v7x = 64 MiB)

    # ---------------- Phase 1: normalize + cast + diagonal ----------------
    cand1 = _divisor_tiles(d)

    def _p1_bytes(t):
        # 2 f32 inputs + 2 compute_dtype outputs, double-buffered, + diag block.
        return 2 * 2 * n * t * 4 + 2 * 2 * n * t * itemsize + 2 * 2 * t * 4

    td1 = next((t for t in cand1 if _p1_bytes(t) <= vmem_budget), cand1[-1])
    n1 = d // td1

    za_n, zb_n, diag = pl.pallas_call(
        functools.partial(_norm_kernel, n=n),
        out_shape=(jax.ShapeDtypeStruct((n, d), compute_dtype),
                   jax.ShapeDtypeStruct((n, d), compute_dtype),
                   jax.ShapeDtypeStruct((1, d), jnp.float32)),
        grid_spec=pltpu.PrefetchScalarGridSpec(
            num_scalar_prefetch=0,
            grid=(n1,),
            in_specs=[pl.BlockSpec((n, td1), lambda i: (0, i)),
                      pl.BlockSpec((n, td1), lambda i: (0, i))],
            out_specs=(pl.BlockSpec((n, td1), lambda i: (0, i)),
                       pl.BlockSpec((n, td1), lambda i: (0, i)),
                       pl.BlockSpec((1, td1), lambda i: (0, i))),
        ),
        compiler_params=pltpu.CompilerParams(
            dimension_semantics=("parallel",),
            vmem_limit_bytes=vmem_limit),
    )(z_a, z_b)

    # Ragged D: zero-pad the NORMALIZED arrays to a multiple of 128.  Padded
    # columns contribute exactly 0 to lambda*sum(c^2) and the diagonal
    # correction only runs over the real D, so this is exact.
    d_pad = d if d % 128 == 0 else ((d + 127) // 128) * 128
    if d_pad != d:
        pad = ((0, 0), (0, d_pad - d))
        za_n = jnp.pad(za_n, pad)
        zb_n = jnp.pad(zb_n, pad)

    # ---------------- Phase 2: tiled lambda * sum(c^2) ----------------
    cand2 = _divisor_tiles(d_pad)
    td_j = tile_j if tile_j is not None else (256 if d_pad % 256 == 0 else 128)
    assert d_pad % td_j == 0
    n_j = d_pad // td_j

    # Resident LHS tile: as large as the VMEM budget allows, but keep >= 2 Di
    # tiles when D permits so both v7x TensorCores get work.
    max_ti = d_pad // 2 if d_pad >= 256 else d_pad

    def _p2_bytes(ti):
        return (2 * n * ti * itemsize        # resident LHS slab (double-buffered)
                + 2 * n * td_j * itemsize    # streamed RHS slab (double-buffered)
                + 2 * 8 * td_j * 4           # (1, 8, td_j) accumulator
                + 2 * ti * td_j * 4)         # c tile + squared temp

    ti_cands = [t for t in cand2 if t <= max_ti] or [cand2[-1]]
    td_i = tile_i if tile_i is not None else next(
        (t for t in ti_cands if _p2_bytes(t) <= vmem_budget), ti_cands[-1])
    assert d_pad % td_i == 0
    n_i = d_pad // td_i

    cost = pl.CostEstimate(
        flops=int(2 * n * d_pad * d_pad),
        transcendentals=0,
        bytes_accessed=int(n * d_pad * itemsize * (n_i + 1) + n_i * 8 * td_j * 4),
    )

    partials = pl.pallas_call(
        functools.partial(_corr_kernel,
                          lam_over_n2=float(lambda_param) / float(n * n)),
        out_shape=jax.ShapeDtypeStruct((n_i, 8, td_j), jnp.float32),
        grid_spec=pltpu.PrefetchScalarGridSpec(
            num_scalar_prefetch=0,
            grid=(n_i, n_j),
            in_specs=[pl.BlockSpec((n, td_i), lambda i, j: (0, i)),
                      pl.BlockSpec((n, td_j), lambda i, j: (0, j))],
            out_specs=pl.BlockSpec((1, 8, td_j), lambda i, j: (i, 0, 0)),
        ),
        compiler_params=pltpu.CompilerParams(
            dimension_semantics=("parallel", "arbitrary"),
            vmem_limit_bytes=vmem_limit),
        cost_estimate=cost,
    )(za_n, zb_n)

    # loss = lambda * sum_all(c^2) + sum_k [(c_kk - 1)^2 - lambda * c_kk^2]
    diag_k = diag[0]
    correction = jnp.sum((diag_k - 1.0) ** 2 - lambda_param * diag_k * diag_k)
    return jnp.sum(partials) + correction


def _reference_loss(z_a, z_b, lambda_param=0.005):
    """Pure-JAX reference mirroring the PyTorch module exactly."""
    za_n = (z_a - z_a.mean(0)) / z_a.std(0, ddof=1)
    zb_n = (z_b - z_b.mean(0)) / z_b.std(0, ddof=1)
    n, d = z_a.shape
    c = (za_n.T @ zb_n) / n
    c_diff = (c - jnp.eye(d)) ** 2
    scale = jnp.where(jnp.eye(d, dtype=bool), 1.0, lambda_param)
    return jnp.sum(c_diff * scale)


if __name__ == "__main__":
    # Small, deterministic example: batch N=8, feature dim D=32 (ragged -> padded).
    key = jax.random.PRNGKey(0)
    k0, k1 = jax.random.split(key)
    N, D = 8, 32
    z_a = jax.random.normal(k0, (N, D), dtype=jnp.float32)
    z_b = jax.random.normal(k1, (N, D), dtype=jnp.float32)

    ref = jax.block_until_ready(_reference_loss(z_a, z_b))

    # f32-MXU path: tight tolerance against the reference.
    loss_f32 = jax.block_until_ready(barlow_twins_loss(z_a, z_b, use_bf16_mxu=False))
    assert jnp.isfinite(loss_f32), "non-finite loss (f32 path)"
    assert jnp.allclose(loss_f32, ref, rtol=1e-4, atol=1e-4), (loss_f32, ref)

    # bf16-MXU path (default; f32 accumulation, exact f32 diagonal): looser tolerance.
    loss_bf16 = jax.block_until_ready(barlow_twins_loss(z_a, z_b))
    assert jnp.isfinite(loss_bf16), "non-finite loss (bf16 path)"
    assert jnp.allclose(loss_bf16, ref, rtol=2e-2, atol=1e-2), (loss_bf16, ref)

    print("KERNEL_OK")
</pallas_src>

<mosaic_0001>
module attributes {stable_mosaic.version = 11 : i64} {
  func.func @_norm_kernel(%arg0: i32, %arg1: memref<8x32xf32, #tpu.memory_space<vmem>>, %arg2: memref<8x32xf32, #tpu.memory_space<vmem>>, %arg3: memref<8x32xf32, #tpu.memory_space<vmem>>, %arg4: memref<8x32xf32, #tpu.memory_space<vmem>>, %arg5: memref<1x32xf32, #tpu.memory_space<vmem>>) attributes {dimension_semantics = [#tpu.dimension_semantics<parallel>], iteration_bounds = array<i64: 1>, scalar_prefetch = 0 : i64, scratch_operands = 0 : i64, tpu.core_type = #tpu.core_type<tc>, window_params = [{transform_indices = @transform_0, window_bounds = array<i64: 8, 32>}, {transform_indices = @transform_1, window_bounds = array<i64: 8, 32>}, {transform_indices = @transform_2, window_bounds = array<i64: 8, 32>}, {transform_indices = @transform_3, window_bounds = array<i64: 8, 32>}, {transform_indices = @transform_4, window_bounds = array<i64: 1, 32>}]} {
    %c0 = arith.constant 0 : index
    %c0_0 = arith.constant 0 : index
    %0 = vector.load %arg1[%c0, %c0_0] : memref<8x32xf32, #tpu.memory_space<vmem>>, vector<8x32xf32>
    %cst = arith.constant dense<0.000000e+00> : vector<32xf32>
    %1 = vector.multi_reduction <add>, %0, %cst [0] : vector<8x32xf32> to vector<32xf32>
    %2 = vector.shape_cast %1 : vector<32xf32> to vector<1x32xf32>
    %cst_1 = arith.constant 1.250000e-01 : f32
    %3 = vector.broadcast %cst_1 : f32 to vector<1x32xf32>
    %4 = arith.mulf %2, %3 : vector<1x32xf32>
    %5 = vector.broadcast %4 : vector<1x32xf32> to vector<8x32xf32>
    %6 = arith.subf %0, %5 : vector<8x32xf32>
    %7 = arith.mulf %6, %6 : vector<8x32xf32>
    %cst_2 = arith.constant dense<0.000000e+00> : vector<32xf32>
    %8 = vector.multi_reduction <add>, %7, %cst_2 [0] : vector<8x32xf32> to vector<32xf32>
    %9 = vector.shape_cast %8 : vector<32xf32> to vector<1x32xf32>
    %cst_3 = arith.constant 0.142857149 : f32
    %10 = vector.broadcast %cst_3 : f32 to vector<1x32xf32>
    %11 = arith.mulf %9, %10 : vector<1x32xf32>
    %12 = math.rsqrt %11 : vector<1x32xf32>
    %13 = vector.broadcast %12 : vector<1x32xf32> to vector<8x32xf32>
    %14 = arith.mulf %6, %13 : vector<8x32xf32>
    %c0_4 = arith.constant 0 : index
    %c0_5 = arith.constant 0 : index
    %15 = vector.load %arg2[%c0_4, %c0_5] : memref<8x32xf32, #tpu.memory_space<vmem>>, vector<8x32xf32>
    %cst_6 = arith.constant dense<0.000000e+00> : vector<32xf32>
    %16 = vector.multi_reduction <add>, %15, %cst_6 [0] : vector<8x32xf32> to vector<32xf32>
    %17 = vector.shape_cast %16 : vector<32xf32> to vector<1x32xf32>
    %cst_7 = arith.constant 1.250000e-01 : f32
    %18 = vector.broadcast %cst_7 : f32 to vector<1x32xf32>
    %19 = arith.mulf %17, %18 : vector<1x32xf32>
    %20 = vector.broadcast %19 : vector<1x32xf32> to vector<8x32xf32>
    %21 = arith.subf %15, %20 : vector<8x32xf32>
    %22 = arith.mulf %21, %21 : vector<8x32xf32>
    %cst_8 = arith.constant dense<0.000000e+00> : vector<32xf32>
    %23 = vector.multi_reduction <add>, %22, %cst_8 [0] : vector<8x32xf32> to vector<32xf32>
    %24 = vector.shape_cast %23 : vector<32xf32> to vector<1x32xf32>
    %cst_9 = arith.constant 0.142857149 : f32
    %25 = vector.broadcast %cst_9 : f32 to vector<1x32xf32>
    %26 = arith.mulf %24, %25 : vector<1x32xf32>
    %27 = math.rsqrt %26 : vector<1x32xf32>
    %28 = vector.broadcast %27 : vector<1x32xf32> to vector<8x32xf32>
    %29 = arith.mulf %21, %28 : vector<8x32xf32>
    %c0_10 = arith.constant 0 : index
    %c0_11 = arith.constant 0 : index
    %30 = vector.load %arg3[%c0_10, %c0_11] : memref<8x32xf32, #tpu.memory_space<vmem>>, vector<8x32xf32>
    tpu.vector_store %arg3[%c0_10, %c0_11], %14 {strides = array<i32>} : memref<8x32xf32, #tpu.memory_space<vmem>>, vector<8x32xf32>,
    %c0_12 = arith.constant 0 : index
    %c0_13 = arith.constant 0 : index
    %31 = vector.load %arg4[%c0_12, %c0_13] : memref<8x32xf32, #tpu.memory_space<vmem>>, vector<8x32xf32>
    tpu.vector_store %arg4[%c0_12, %c0_13], %29 {strides = array<i32>} : memref<8x32xf32, #tpu.memory_space<vmem>>, vector<8x32xf32>,
    %32 = arith.mulf %14, %29 : vector<8x32xf32>
    %cst_14 = arith.constant dense<0.000000e+00> : vector<32xf32>
    %33 = vector.multi_reduction <add>, %32, %cst_14 [0] : vector<8x32xf32> to vector<32xf32>
    %34 = vector.shape_cast %33 : vector<32xf32> to vector<1x32xf32>
    %cst_15 = arith.constant 1.250000e-01 : f32
    %35 = vector.broadcast %cst_15 : f32 to vector<1x32xf32>
    %36 = arith.mulf %34, %35 : vector<1x32xf32>
    %c0_16 = arith.constant 0 : index
    %c0_17 = arith.constant 0 : index
    %37 = vector.load %arg5[%c0_16, %c0_17] : memref<1x32xf32, #tpu.memory_space<vmem>>, vector<1x32xf32>
    tpu.vector_store %arg5[%c0_16, %c0_17], %36 {strides = array<i32>} : memref<1x32xf32, #tpu.memory_space<vmem>>, vector<1x32xf32>,
    return
  }
  func.func @transform_0(%arg0: i32) -> (i32, i32) {
    %c0_i32 = arith.constant 0 : i32
    %c0_i32_0 = arith.constant 0 : i32
    return %c0_i32, %arg0 : i32, i32
  }
  func.func @transform_1(%arg0: i32) -> (i32, i32) {
    %c0_i32 = arith.constant 0 : i32
    %c0_i32_0 = arith.constant 0 : i32
    return %c0_i32, %arg0 : i32, i32
  }
  func.func @transform_2(%arg0: i32) -> (i32, i32) {
    %c0_i32 = arith.constant 0 : i32
    %c0_i32_0 = arith.constant 0 : i32
    return %c0_i32, %arg0 : i32, i32
  }
  func.func @transform_3(%arg0: i32) -> (i32, i32) {
    %c0_i32 = arith.constant 0 : i32
    %c0_i32_0 = arith.constant 0 : i32
    return %c0_i32, %arg0 : i32, i32
  }
  func.func @transform_4(%arg0: i32) -> (i32, i32) {
    %c0_i32 = arith.constant 0 : i32
    %c0_i32_0 = arith.constant 0 : i32
    return %c0_i32, %arg0 : i32, i32
  }
}

</mosaic_0001>

<bundles_post_ra>
// kernel: tpu_custom_call.1
= control target key start
LH: loop header
LB: loop body
LE: loop exit
PB: predicated region body
PF: predicated region fallthrough
CT: control target
= control target key end

     0   :  { %10 = vsyncpa [#allocation3], 0  ;;  %s356_s0 = inlined_call_operand.hbm [shape: f32[8,32], index: 0, kind: input, shape index: {}]   ;;  %s357_s1 = inlined_call_operand.hbm [shape: f32[8,32], index: 1, kind: input, shape index: {}]   ;;  %s358_s2 = inlined_call_operand.hbm [shape: f32[8,32], index: 2, kind: output, shape index: {0}]   ;;  %s359_s3 = inlined_call_operand.hbm [shape: f32[8,32], index: 3, kind: output, shape index: {1}]   ;;  %s360_s4 = inlined_call_operand.hbm [shape: f32[1,32], index: 4, kind: output, shape index: {2}]  }
   0x1   :  { %11 = vsyncpa [#allocation6], 0 }
   0x2   :  { %12 = vsyncpa [#allocation4], 0 }
   0x3   :  { %13 = vsyncpa [#allocation9], 0  ;;  %s19_s17 = sshll.u32 %s356_s0, 4  ;;  %s304_s18 = smov [#allocation2]   ;;  %s20_s17 = int_to_ptr.hbm [resolvable:$true] %s19_s17 }
   0x4   :  { %s21_s19 = sshll.u32 %s304_s18, 4  ;;  %s30_s22 = sshll.u32 %s357_s1, 4  ;;  %s22_s19 = int_to_ptr.vmem [resolvable:$true] %s21_s19  ;;  %s31_s22 = int_to_ptr.hbm [resolvable:$true] %s30_s22 }
   0x5   :  { %24 = dma.hbm_to_vmem [thread:$0]  %s20_s17, 128, %s22_s19, [#allocation3]  }
   0x6   :  { %s305_s23 = smov [#allocation5]  }
   0x7   :  { %s32_s24 = sshll.u32 %s305_s23, 4  ;;  %s33_s24 = int_to_ptr.vmem [resolvable:$true] %s32_s24 }
   0x8   :  { %35 = dma.hbm_to_vmem [thread:$0]  %s31_s22, 128, %s33_s24, [#allocation6]  }
   0x9   :  { %296 = dma.done.wait [#allocation3], 128  }
   0xa   :  { %297 = vsyncadd [#allocation3], 4294967168 }
   0xb   :  { %298 = dma.done.wait [#allocation6], 128  }
   0xc   :  { %299 = vsyncadd [#allocation6], 4294967168  ;;  %vm45_vm0 = vcmask 261120   ;;  %v75_v0 = vld [vmem:[#allocation5] sm:$0xff]  ;;  %v44_v1 = vld [vmem:[#allocation2] sm:$0xff]  ;;  %s306_s0 = smov [#allocation8]  }
   0xd   :  { %v76_v2 = vsel %vm45_vm0, %v75_v0, 0.0  ;;  %v46_v3 = vsel %vm45_vm0, %v44_v1, 0.0  ;;  %s134_s1 = sshll.u32 %s306_s0, 4  ;;  %s136_s27 = sshll.u32 %s359_s3, 4  ;;  %vm116_vm7 = vcmask 253952   ;;  %s135_s1 = int_to_ptr.vmem [resolvable:$true] %s134_s1  ;;  %s137_s27 = int_to_ptr.hbm [resolvable:$true] %s136_s27 }
   0xe   :  { %v77_v4 = vrot.slane %v76_v2, 4  ;;  %v47_v5 = vrot.slane %v46_v3, 4  ;;  %s307_s28 = smov [#allocation7]   ;;  %s125_s6 = sshll.u32 %s358_s2, 4  ;;  %s126_s6 = int_to_ptr.hbm [resolvable:$true] %s125_s6 }
   0xf   :  { %s123_s29 = sshll.u32 %s307_s28, 4  ;;  %s308_s2 = smov [#allocation10]   ;;  %s124_s29 = int_to_ptr.vmem [resolvable:$true] %s123_s29 }
  0x10   :  { %v78_v6 = vadd.f32 %v77_v4, %v76_v2  ;;  %v48_v7 = vadd.f32 %v47_v5, %v46_v3  ;;  %s145_s3 = sshll.u32 %s308_s2, 4  ;;  %s147_s9 = sshll.u32 %s360_s4, 4  ;;  %s146_s3 = int_to_ptr.vmem [resolvable:$true] %s145_s3  ;;  %s148_s9 = int_to_ptr.hbm [resolvable:$true] %s147_s9 }
  0x12   :  { %v79_v8 = vrot.slane %v78_v6, 2  ;;  %v49_v9 = vrot.slane %v48_v7, 2 }
  0x14   :  { %v80_v10 = vadd.f32 %v79_v8, %v78_v6  ;;  %v50_v11 = vadd.f32 %v49_v9, %v48_v7 }
  0x16   :  { %v81_v12 = vrot.slane %v80_v10, 1  ;;  %v51_v13 = vrot.slane %v50_v11, 1 }
  0x18   :  { %v82_v14 = vadd.f32 %v81_v12, %v80_v10  ;;  %v52_v15 = vadd.f32 %v51_v13, %v50_v11 }
  0x1a   :  { %v83_v16 = vmul.f32 0.125, %v82_v14  ;;  %v53_v17 = vmul.f32 0.125, %v52_v15 }
  0x1c   :  { %v84_v18 = vsub.f32 %v75_v0, %v83_v16  ;;  %v54_v19 = vsub.f32 %v44_v1, %v53_v17 }
  0x1e   :  { %v85_v20 = vmul.f32 %v84_v18, %v84_v18  ;;  %v55_v21 = vmul.f32 %v54_v19, %v54_v19 }
  0x20   :  { %v86_v22 = vsel %vm45_vm0, %v85_v20, 0.0  ;;  %v56_v23 = vsel %vm45_vm0, %v55_v21, 0.0 }
  0x21   :  { %v87_v24 = vrot.slane %v86_v22, 4  ;;  %v57_v25 = vrot.slane %v56_v23, 4 }
  0x23   :  { %v88_v26 = vadd.f32 %v87_v24, %v86_v22  ;;  %v58_v27 = vadd.f32 %v57_v25, %v56_v23 }
  0x25   :  { %v89_v28 = vrot.slane %v88_v26, 2  ;;  %v59_v29 = vrot.slane %v58_v27, 2 }
  0x27   :  { %v90_v30 = vadd.f32 %v89_v28, %v88_v26  ;;  %v60_v31 = vadd.f32 %v59_v29, %v58_v27 }
  0x29   :  { %v91_v32 = vrot.slane %v90_v30, 1  ;;  %v61_v33 = vrot.slane %v60_v31, 1 }
  0x2b   :  { %v92_v34 = vadd.f32 %v91_v32, %v90_v30  ;;  %v62_v35 = vadd.f32 %v61_v33, %v60_v31 }
  0x2d   :  { %v93_v36 = vmul.f32 0.14285715, %v92_v34  ;;  %v63_v37 = vmul.f32 0.14285715, %v62_v35 }
  0x2f   :  { %172 = vrsqrt.f32 %v93_v36  ;;  %vm100_vm1 = vweird.f32 %v93_v36  ;;  %vm70_vm3 = vweird.f32 %v63_v37 }
  0x30   :  { %174 = vrsqrt.f32 %v63_v37 }
  0x35   :  { %v173_v38 = vpop.eup %172 }
  0x36   :  { %v175_v39 = vpop.eup %174  ;;  %v95_v40 = vmul.f32 %v173_v38, %v93_v36  ;;  %vm101_vm2 = vweird.f32 %v173_v38 }
  0x37   :  { %v65_v41 = vmul.f32 %v175_v39, %v63_v37  ;;  %vm71_vm4 = vweird.f32 %v175_v39  ;;  %vm102_vm5 = vmor %vm100_vm1, %vm101_vm2 }
  0x38   :  { %v96_v42 = vmul.f32 %v173_v38, %v95_v40  ;;  %vm72_vm6 = vmor %vm70_vm3, %vm71_vm4 }
  0x39   :  { %v66_v43 = vmul.f32 %v175_v39, %v65_v41 }
  0x3a   :  { %v97_v44 = vmul.f32 0.5, %v96_v42 }
  0x3b   :  { %v67_v45 = vmul.f32 0.5, %v66_v43 }
  0x3c   :  { %v98_v46 = vsub.f32 1.5, %v97_v44 }
  0x3d   :  { %v68_v47 = vsub.f32 1.5, %v67_v45 }
  0x3e   :  { %v99_v48 = vmul.f32 %v173_v38, %v98_v46 }
  0x3f   :  { %v69_v49 = vmul.f32 %v175_v39, %v68_v47 }
  0x40   :  { %v103_v50 = vsel %vm102_vm5, %v173_v38, %v99_v48 }
  0x41   :  { %v104_v51 = vmul.f32 %v103_v50, %v84_v18  ;;  %v73_v52 = vsel %vm72_vm6, %v175_v39, %v69_v49 }
  0x42   :  { %v74_v53 = vmul.f32 %v73_v52, %v54_v19 }
  0x43   :  { %106 = vst.msk [vmem:[#allocation8] sm:$0xff] %vm45_vm0, %v104_v51 }
  0x44   :  { %105 = vst.msk [vmem:[#allocation7] sm:$0xff] %vm45_vm0, %v74_v53  ;;  %v107_v54 = vmul.f32 %v104_v51, %v74_v53  ;;  %139 = dma.vmem_to_hbm [thread:$0]  %s135_s1, 128, %s137_s27, [#allocation9]  }
  0x45   :  { %128 = dma.vmem_to_hbm [thread:$0]  %s124_s29, 128, %s126_s6, [#allocation4]  }
  0x46   :  { %v108_v55 = vsel %vm45_vm0, %v107_v54, 0.0 }
  0x47   :  { %v109_v56 = vrot.slane %v108_v55, 4 }
  0x49   :  { %v110_v57 = vadd.f32 %v109_v56, %v108_v55 }
  0x4b   :  { %v111_v58 = vrot.slane %v110_v57, 2 }
  0x4d   :  { %v112_v59 = vadd.f32 %v111_v58, %v110_v57 }
  0x4f   :  { %v113_v60 = vrot.slane %v112_v59, 1 }
  0x51   :  { %v114_v61 = vadd.f32 %v113_v60, %v112_v59 }
  0x53   :  { %v115_v62 = vmul.f32 0.125, %v114_v61 }
  0x55   :  { %117 = vst.msk [vmem:[#allocation10] sm:$0x1] %vm116_vm7, %v115_v62 }
  0x56   :  { %150 = dma.vmem_to_hbm [thread:$0]  %s146_s3, 16, %s148_s9, [#allocation9]  }
  0x57   :  { %300 = dma.done.wait [#allocation4], 128  }
  0x58   :  { %301 = vsyncadd [#allocation4], 4294967168 }
  0x59   :  { %302 = dma.done.wait [#allocation9], 144  }
  0x5a   :  { %303 = vsyncadd [#allocation9], 4294967152 }
  0x5b   :  { %163 = vsyncpa [#allocation3], 1 }
  0x5c   :  { %164 = vsyncpa [#allocation6], 1 }
  0x5d   :  { %165 = vsyncpa [#allocation4], 1 }
  0x5e   :  { %166 = vsyncpa [#allocation9], 1 }

</bundles_post_ra>
